<compile_context>
chip_gen: v5e
topology: v5e:2x2
jax: 0.10.0
libtpu: 0.0.40
codegen_flags: <defaults>
</compile_context>

<pallas_src>
import jax
import jax.numpy as jnp
from jax import lax
from jax.experimental import pallas as pl
from jax.experimental.pallas import tpu as pltpu


def _skipgram_scores_kernel(c_ref, w_ref, o_ref):
    # c_ref: (B, D)   gathered center-word embeddings (resident across grid)
    # w_ref: (TV, D)  one vocab tile of the output-embedding table
    # o_ref: (B, TV)  logits for this vocab tile
    #
    # Contract the D axis of both operands directly -> no in-kernel transpose.
    o_ref[...] = lax.dot_general(
        c_ref[...],
        w_ref[...],
        dimension_numbers=(((1,), (1,)), ((), ())),
        preferred_element_type=jnp.float32,
    ).astype(o_ref.dtype)


def _pick_vocab_tile(V, tv):
    """Lane-aligned vocab tile; keep >= 2 grid steps when the vocab allows it
    so dimension_semantics=("parallel",) can shard across 2 TCs on v7x."""
    v128 = pl.cdiv(V, 128) * 128
    tv_eff = min(int(tv), v128)
    tv_eff = max(128, (tv_eff // 128) * 128)          # multiple of 128 lanes
    if pl.cdiv(V, tv_eff) < 2 and v128 >= 256:
        tv_eff = pl.cdiv(pl.cdiv(v128, 2), 128) * 128  # split into ~2 tiles
    return tv_eff


def skipgram_forward(x_ids, in_embed, out_embed, *, tv=16384,
                     out_dtype=jnp.float32):
    """logits[b, v] = <in_embed[x_ids[b]], out_embed[v]>

    x_ids:     (B,)   int32 center-word ids
    in_embed:  (V, D) embedding table for center words (any float dtype)
    out_embed: (V, D) embedding table for context words; its dtype is the
               streaming/compute dtype (bf16 recommended -> halves HBM bytes).
    Returns (B, V) logits in `out_dtype` (default f32; bf16 halves the
    (B, V) writeback stream if downstream tolerates it).
    """
    V, D = in_embed.shape
    B = x_ids.shape[0]
    compute_dtype = out_embed.dtype
    w_itemsize = jnp.dtype(compute_dtype).itemsize
    o_itemsize = jnp.dtype(out_dtype).itemsize

    # Glue: embedding lookup for the (small) batch of center words, cast to
    # the MXU compute dtype so both matmul operands share a dtype.
    # TODO(synk): for large B this gather could be fused into the kernel via
    # PrefetchScalarGridSpec + pl.Element row gather; marginal at small B.
    center = jnp.take(in_embed, x_ids, axis=0).astype(compute_dtype)  # (B, D)

    # --- tile sizing (no table padding / copying) -------------------------
    tv_eff = _pick_vocab_tile(V, tv)
    grid_v = pl.cdiv(V, tv_eff)   # ragged last block handled by Pallas:
                                  # OOB weight rows only feed output columns
                                  # >= V, which are never written back.

    cost = pl.CostEstimate(
        flops=2 * B * D * V,
        bytes_accessed=V * D * w_itemsize            # dominant weight stream
        + B * V * o_itemsize                         # logits writeback
        + B * D * w_itemsize,                        # center embeddings
        transcendentals=0,
    )

    # VMEM: double-buffered weight tiles + double-buffered output tiles +
    # resident center block.  48 MiB keeps headroom under v7x's 64 MiB
    # physical VMEM and overrides v5e's 16 MiB scoped default.
    vmem_limit = 48 * 1024 * 1024

    logits = pl.pallas_call(
        _skipgram_scores_kernel,
        out_shape=jax.ShapeDtypeStruct((B, V), out_dtype),
        grid=(grid_v,),
        in_specs=[
            pl.BlockSpec((B, D), lambda j: (0, 0)),       # center, resident
            pl.BlockSpec((tv_eff, D), lambda j: (j, 0)),  # big vocab tile
        ],
        out_specs=pl.BlockSpec((B, tv_eff), lambda j: (0, j)),
        compiler_params=pltpu.CompilerParams(
            dimension_semantics=("parallel",),            # 2-TC sharding on v7x
            vmem_limit_bytes=vmem_limit,
        ),
        cost_estimate=cost,
    )(center, out_embed)

    return logits


if __name__ == "__main__":
    # Small, deterministic problem: vocab V=512, embed dim D=128, batch B=8.
    V, D, B = 512, 128, 8

    key = jax.random.PRNGKey(0)
    k_in, k_out, k_ids = jax.random.split(key, 3)

    in_embed = jax.random.normal(k_in, (V, D), dtype=jnp.float32) * 0.02
    # Stream the context-embedding table in bf16 (dominant HBM stream).
    out_embed = (jax.random.normal(k_out, (V, D), dtype=jnp.float32) * 0.02).astype(
        jnp.bfloat16
    )
    x_ids = jax.random.randint(k_ids, (B,), 0, V, dtype=jnp.int32)

    logits = skipgram_forward(x_ids, in_embed, out_embed)
    logits = jax.block_until_ready(logits)

    # Reference check (plain JAX, same bf16 operands, f32 accumulation).
    cen_ref = jnp.take(in_embed, x_ids, axis=0).astype(jnp.bfloat16)
    ref = lax.dot_general(
        cen_ref,
        out_embed,
        dimension_numbers=(((1,), (1,)), ((), ())),
        preferred_element_type=jnp.float32,
    )
    assert logits.shape == (B, V)
    assert jnp.allclose(logits, ref, atol=1e-3, rtol=1e-3)

    print("KERNEL_OK")
</pallas_src>

<mosaic_0001>
module attributes {stable_mosaic.version = 11 : i64} {
  func.func @_skipgram_scores_kernel(%arg0: i32, %arg1: memref<8x128xbf16, #tpu.memory_space<vmem>>, %arg2: memref<256x128xbf16, #tpu.memory_space<vmem>>, %arg3: memref<8x256xf32, #tpu.memory_space<vmem>>) attributes {dimension_semantics = [#tpu.dimension_semantics<parallel>], iteration_bounds = array<i64: 2>, scalar_prefetch = 0 : i64, scratch_operands = 0 : i64, tpu.core_type = #tpu.core_type<tc>, window_params = [{pipeline_mode = #tpu.pipeline_mode<synchronous>, transform_indices = @transform_0, window_bounds = array<i64: 8, 128>}, {transform_indices = @transform_1, window_bounds = array<i64: 256, 128>}, {transform_indices = @transform_2, window_bounds = array<i64: 8, 256>}]} {
    %c0 = arith.constant 0 : index
    %c0_0 = arith.constant 0 : index
    %0 = vector.load %arg1[%c0, %c0_0] : memref<8x128xbf16, #tpu.memory_space<vmem>>, vector<8x128xbf16>
    %c0_1 = arith.constant 0 : index
    %c0_2 = arith.constant 0 : index
    %1 = vector.load %arg2[%c0_1, %c0_2] : memref<256x128xbf16, #tpu.memory_space<vmem>>, vector<256x128xbf16>
    %cst = arith.constant dense<0.000000e+00> : vector<8x256xf32>
    %2 = tpu.matmul %0, %1, %cst {dimension_numbers = #tpu.dot_dimension_numbers<[1], [1], [0], [0], [0, 0, 1, 0], [], []>} : vector<8x128xbf16>, vector<256x128xbf16>, vector<8x256xf32> -> vector<8x256xf32>
    %c0_3 = arith.constant 0 : index
    %c0_4 = arith.constant 0 : index
    %3 = vector.load %arg3[%c0_3, %c0_4] : memref<8x256xf32, #tpu.memory_space<vmem>>, vector<8x256xf32>
    tpu.vector_store %arg3[%c0_3, %c0_4], %2 {strides = array<i32>} : memref<8x256xf32, #tpu.memory_space<vmem>>, vector<8x256xf32>,
    return
  }
  func.func @transform_0(%arg0: i32) -> (i32, i32) {
    %c0_i32 = arith.constant 0 : i32
    %c0_i32_0 = arith.constant 0 : i32
    %c0_i32_1 = arith.constant 0 : i32
    return %c0_i32, %c0_i32_0 : i32, i32
  }
  func.func @transform_1(%arg0: i32) -> (i32, i32) {
    %c0_i32 = arith.constant 0 : i32
    %c0_i32_0 = arith.constant 0 : i32
    return %arg0, %c0_i32 : i32, i32
  }
  func.func @transform_2(%arg0: i32) -> (i32, i32) {
    %c0_i32 = arith.constant 0 : i32
    %c0_i32_0 = arith.constant 0 : i32
    return %c0_i32, %arg0 : i32, i32
  }
}

</mosaic_0001>

<bundles_post_ra>
// kernel: tpu_custom_call.1
= control target key start
LH: loop header
LB: loop body
LE: loop exit
PB: predicated region body
PF: predicated region fallthrough
CT: control target
= control target key end

     0   :  { %7 = vsyncpa [#allocation3], 0  ;;  %s905_s0 = inlined_call_operand.hbm [shape: bf16[8,128], index: 0, kind: input, shape index: {}]   ;;  %s906_s1 = inlined_call_operand.hbm [shape: bf16[512,128], index: 1, kind: input, shape index: {}]   ;;  %s907_s2 = inlined_call_operand.hbm [shape: f32[8,512], index: 2, kind: output, shape index: {}]  }
   0x1   :  { %8 = vsyncpa [#allocation6], 0 }
   0x2   :  { %10 = vsyncpa [#allocation6 + $0x1], 0 }
   0x3   :  { %11 = vsyncpa [#allocation4], 0 }
   0x4   :  { %13 = vsyncpa [#allocation4 + $0x1], 0  ;;  %s744_s9 = smov 0   ;;  %s746_s10 = smov 0  }
   0x5   :  { %s748_s11 = smov 0   ;;  %s750_s12 = smov 0  }
   0x6 LB: > { %s765_s13 = sadd.s32 4294967295, %s724_s12   ;;  %s437_s14 = sadd.s32 4294967294, %s724_s12   ;;  %s724_s12 = sphi %s750_s12, %s918_s12   ;;  %s720_s11 = sphi %s748_s11, %s917_s11   ;;  %s716_s10 = sphi %s746_s10, %s916_s10   ;;  %s712_s9 = sphi %s744_s9, %s915_s9  }
   0x7   : > { %s769_s15 = sadd.s32 1, %s724_s12   ;;  %s47_s16 = sadd.s32 1, %s720_s11 }
   0x8   : > { %s44_s17 = ssub.s32 %s724_s12, %s769_s15  ;;  %p54_p0 = scmp.ne.s32.totalorder %s720_s11, %s716_s10 }
   0x9   : > { %p45_p1 = scmp.eq.s32.totalorder %s44_s17, 0  ;;  %p55_p2 = scmp.eq.s32.totalorder %s724_s12, 0 }
   0xa   : > { %p60_p3 = scmp.ne.s32.totalorder %s716_s10, %s712_s9  ;;  %p61_p4 = scmp.eq.s32.totalorder %s765_s13, 0 }
   0xb   : > { %s781_s18 = scalar_select %p45_p1, %s720_s11, %s47_s16  }
   0xc   : > { %p783_p5 = por %p55_p2, %p54_p0  ;;  %p789_p6 = por %p61_p4, %p60_p3 }
   0xd   : > { %p84_p7 = scmp.eq.s32.totalorder %s765_s13, 1  ;;  %p90_p8 = scmp.eq.s32.totalorder %s437_s14, 1 }
   0xe   : > { %p438_p9 = scmp.ge.s32.totalorder %s724_s12, 1  ;;  %p97_p10 = scmp.lt.s32.totalorder %s724_s12, 3 }
   0xf   : > { %p796_p11 = por %p84_p7, %p54_p0  ;;  %p800_p12 = por %p90_p8, %p60_p3 }
  0x10   : > { %p804_p13 = pnand %p438_p9, %p97_p10  ;;  %s109_s26 = sshll.u32 %s905_s0, 4  ;;  %s110_s26 = int_to_ptr.hbm [resolvable:$true] %s109_s26 }
  0x11   : > { %s726_s27 = smov [#allocation2]   ;;  %p556_p3 = scmp.lt.s32.totalorder %s724_s12, 2 }
  0x12   : > { %p543_p1 = pneg %p804_p13  ;;  %s111_s28 = sshll.u32 %s726_s27, 4  ;;  %s112_s28 = int_to_ptr.vmem [resolvable:$true] %s111_s28 }
  0x13   : > { %s122_s29 = sand.u32 1, %s720_s11   ;;  %p820_p7 = pnand %p556_p3, %p783_p5 }
  0x14   : > { %p544_p2 = pnand %p543_p1, %p61_p4  ;;  %s441_s3 = sshll.u32 %s122_s29, 7 }
  0x15   : > { %s517_s4 = sshll.u32 %s724_s12, 7  ;;  %s126_s14 = scalar_lea.vmem [#allocation5], %s441_s3 }
  0x16   : > { %546 = dma.hbm_to_vmem [thread:$0]  (!%p544_p2), %s110_s26, 64, %s112_s28, [#allocation3]  }
  0x17   : > { %s131_s7 = scalar_lea.hbm %s906_s1, %s517_s4  ;;  %s134_s16 = sshll.u32 %s126_s14, 4  ;;  %s135_s16 = int_to_ptr.vmem [resolvable:$true] %s134_s16 }
  0x18   : > { %s132_s8 = sshll.u32 %s131_s7, 4  ;;  %s123_s17 = scalar_lea.sflag [#allocation6], %s122_s29  ;;  %s133_s8 = int_to_ptr.hbm [resolvable:$true] %s132_s8 }
  0x19   : > { %s624_s24 = sshra.s32 %s133_s8, 4  ;;  %p628_p8 = pneg %p820_p7  ;;  %s625_s24 = int_to_ptr.hbm [resolvable:$true] %s624_s24 }
  0x1a   : > { %s626_s19 = scalar_lea.hbm %s625_s24, 128  ;;  %s631_s27 = scalar_lea.hbm %s906_s1, 256 }
  0x1b   : > { %p627_p5 = scmp.ne.s32.totalorder %s625_s24, %s626_s19  ;;  %p632_p1 = scmp.lt.s32.totalorder %s625_s24, %s906_s1 }
  0x1c   : > { %p633_p2 = scmp.lt.s32.totalorder %s631_s27, %s626_s19 }
  0x1d   : > { %p629_p9 = pnand %p628_p8, %p627_p5 }
  0x1e   : > { %p634_p3 = por %p633_p2, %p632_p1 }
  0x1f   : > { %p630_p10 = pneg %p629_p9 }
  0x21   : > { %p635_p0 = pnand %p634_p3, %p630_p10 }
  0x23   : > { %638 = shalt.err (!%p635_p0)
}
  0x24   : > { %s727_s29 = smov 64   ;;  %s728_s3 = smov 4  }
  0x25   : > { %550 = dma.hbm_to_vmem [thread:$0]  (!%p820_p7), %s133_s8, 2048, %s135_s16, %s123_s17, %s727_s29, %s727_s29, %s728_s3  }
  0x26   : > { %146 = sbr.rel (%p804_p13) target bundleno = 247 (0xf7), region = 28 }
  0x2b   : > { %699 = dma.done.wait (%p61_p4), [#allocation3], 64  }
  0x2c   : > { %701 = vsyncadd (%p61_p4), [#allocation3], 4294967232  ;;  %s845_s5 = sand.u32 1, %s716_s10  }
  0x2d   : > { %s446_s6 = sshll.u32 %s845_s5, 7  ;;  %s154_s7 = scalar_lea.sflag [#allocation6], %s845_s5 }
  0x2e   : > { %s849_s14 = scalar_lea.vmem [#allocation5], %s446_s6 }
  0x2f   : > { %703 = dma.done.wait (%p789_p6), %s154_s7, 2048  }
  0x30   : > { %705 = vsyncadd (%p789_p6), %s154_s7, 4294965248  ;;  %v525_v0 = vld [vmem:[%s849_s14 + $0x38] sm:$0xff]  ;;  %v524_v2 = vld [vmem:[%s849_s14 + $0x30] sm:$0xff]  ;;  %s534_s20 = sshll.u32 %s765_s13, 4  ;;  %s447_s23 = sshll.u32 %s845_s5, 4 }
  0x31   : > { %v533_v1 = vld [vmem:[%s849_s14 + $0x78] sm:$0xff]  ;;  %310 = vmatpush.bf16.xpose.msra.mxu0 %v525_v0  ;;  %v532_v3 = vld [vmem:[%s849_s14 + $0x70] sm:$0xff]  ;;  %v523_v4 = vld [vmem:[%s849_s14 + $0x28] sm:$0xff]  ;;  %s350_s16 = scalar_lea.hbm %s907_s2, %s534_s20  ;;  %s178_s17 = scalar_lea.vmem [#allocation7], %s447_s23 }
  0x32   : > { %323 = vmatpush.bf16.xpose.msra.mxu1 %v533_v1  ;;  %v531_v5 = vld [vmem:[%s849_s14 + $0x68] sm:$0xff]  ;;  %v522_v6 = vld [vmem:[%s849_s14 + $0x20] sm:$0xff]  ;;  %v521_v8 = vld [vmem:[%s849_s14 + $0x18] sm:$0xff]  ;;  %s352_s24 = sshll.u32 %s178_s17, 4  ;;  %s354_s19 = sshll.u32 %s350_s16, 4  ;;  %s353_s24 = int_to_ptr.vmem [resolvable:$true] %s352_s24  ;;  %s355_s19 = int_to_ptr.hbm [resolvable:$true] %s354_s19 }
  0x33   : > { %v530_v7 = vld [vmem:[%s849_s14 + $0x60] sm:$0xff]  ;;  %v529_v9 = vld [vmem:[%s849_s14 + $0x58] sm:$0xff]  ;;  %v520_v10 = vld [vmem:[%s849_s14 + $0x10] sm:$0xff]  ;;  %s339_s25 = scalar_lea.sflag [#allocation4], %s845_s5  ;;  %s668_s26 = sshra.s32 %s355_s19, 4  ;;  %s669_s26 = int_to_ptr.hbm [resolvable:$true] %s668_s26 }
  0x34   : > { %v528_v11 = vld [vmem:[%s849_s14 + $0x50] sm:$0xff]  ;;  %v519_v12 = vld [vmem:[%s849_s14 + $0x8] sm:$0xff]  ;;  %v518_v14 = vld [vmem:[%s849_s14] sm:$0xff]  ;;  %s670_s27 = scalar_lea.hbm %s669_s26, 16  ;;  %s674_s4 = scalar_lea.hbm %s907_s2, 32 }
  0x35   : > { %v527_v13 = vld [vmem:[%s849_s14 + $0x48] sm:$0xff]  ;;  %v526_v15 = vld [vmem:[%s849_s14 + $0x40] sm:$0xff]  ;;  %v181_v16 = vld [vmem:[#allocation2] sm:$0xf]  ;;  %p671_p4 = scmp.ne.s32.totalorder %s669_s26, %s670_s27  ;;  %p675_p0 = scmp.lt.s32.totalorder %s669_s26, %s907_s2 }
  0x36   : > { %p676_p7 = scmp.lt.s32.totalorder %s674_s4, %s670_s27 }
  0x37   : > { %p672_p6 = pnand %p671_p4, %p796_p11 }
  0x38   : > { %p677_p5 = por %p676_p7, %p675_p0 }
  0x39   : > { %311 = vmatpush.bf16.xpose.msra.mxu0 %v524_v2  ;;  %p673_p13 = pneg %p672_p6 }
  0x3a   : > { %324 = vmatpush.bf16.xpose.msra.mxu1 %v532_v3 }
  0x3b   : > { %p678_p8 = pnand %p677_p5, %p673_p13 }
  0x41   : > { %312 = vmatpush.bf16.xpose.msra.mxu0 %v523_v4 }
  0x42   : > { %325 = vmatpush.bf16.xpose.msra.mxu1 %v531_v5 }
  0x49   : > { %313 = vmatpush.bf16.xpose.msra.mxu0 %v522_v6 }
  0x4a   : > { %326 = vmatpush.bf16.xpose.msra.mxu1 %v530_v7 }
  0x51   : > { %314 = vmatpush.bf16.xpose.msra.mxu0 %v521_v8 }
  0x52   : > { %327 = vmatpush.bf16.xpose.msra.mxu1 %v529_v9 }
  0x59   : > { %315 = vmatpush.bf16.xpose.msra.mxu0 %v520_v10 }
  0x5a   : > { %328 = vmatpush.bf16.xpose.msra.mxu1 %v528_v11 }
  0x61   : > { %316 = vmatpush.bf16.xpose.msra.mxu0 %v519_v12 }
  0x62   : > { %329 = vmatpush.bf16.xpose.msra.mxu1 %v527_v13 }
  0x69   : > { %317 = vmatpush.bf16.xpose.msra.mxu0 %v518_v14 }
  0x6a   : > { %330 = vmatpush.bf16.xpose.msra.mxu1 %v526_v15 }
  0x70   : > { %318 = vmatmul.bf16.vlgmr.msra.gmra.mxu0 %v181_v16 }
  0x71   : > { %331 = vmatmul.bf16.vlgmr.msra.gmra.mxu1 %v181_v16 }
  0xed   : > { %v319_v17 = vpop.f32.mrf.mxu0 }
  0xee   : > { %v332_v18 = vpop.f32.mrf.mxu1  ;;  %336 = vst [vmem:[%s178_s17] sm:$0xff] %v319_v17 }
  0xef   : > { %337 = vst [vmem:[%s178_s17 + $0x8] sm:$0xff] %v332_v18 }
  0xf0   : > { %681 = shalt.err (!%p678_p8)
}
  0xf1   : > { %541 = dma.vmem_to_hbm [thread:$0]  (%p796_p11), %s353_s24, 256, %s355_s19, %s339_s25  }
  0xf5   : > { %v321_v19 = vpop.f32.mrf.mxu0 }
  0xf6   : > { %v334_v20 = vpop.f32.mrf.mxu1 }
  0xf7 PF: > { %s366_s5 = sand.u32 1, %s712_s9   ;;  %p914_p9 = scmp.ge.s32.totalorder %s724_s12, 2 }
  0xf8   : > { %s367_s6 = scalar_lea.sflag [#allocation4], %s366_s5 }
  0xf9   : > { %p552_p10 = pnand %p914_p9, %p800_p12 }
  0xfb   : > { %p553_p1 = pneg %p552_p10 }
  0xfd   : > { %707 = dma.done.wait (%p553_p1), %s367_s6, 256  }
  0xfe   : > { %709 = vsyncadd (%p553_p1), %s367_s6, 4294967040  ;;  %p16_p11 = scmp.ge.s32.totalorder %s769_s15, 4   ;;  %s915_s9 = smov %s716_s10 }
  0xff   : > { %s916_s10 = smov %s720_s11  ;;  %s917_s11 = smov %s781_s18 }
 0x100   : > { %s918_s12 = smov %s769_s15  ;;  %18 = sbr.rel (!%p16_p11) target bundleno = 6 (0x6), region = 78 }
 0x105   :  { %373 = vsyncpa [#allocation3], 1 }
 0x106   :  { %375 = vsyncpa [#allocation3 + $0x1], 1 }
 0x107   :  { %376 = vsyncpa [#allocation6], 1 }
 0x108   :  { %378 = vsyncpa [#allocation6 + $0x1], 1 }
 0x109   :  { %379 = vsyncpa [#allocation4], 1 }
 0x10a   :  { %381 = vsyncpa [#allocation4 + $0x1], 1 }

</bundles_post_ra>
